<compile_context>
chip_gen: v5e
topology: v5e:2x2
jax: 0.10.0
libtpu: 0.0.40
codegen_flags: <defaults>
</compile_context>

<pallas_src>
import jax
import jax.numpy as jnp
from jax.experimental import pallas as pl
from jax.experimental.pallas import tpu as pltpu

_MAX_LANE = 2048          # cap lane width; keeps rows large enough for good tiling
_FALLBACK_LANE = 512      # used only when x.size has no multiple-of-128 divisor


def _to_sigma_kernel(x_ref, o_ref):
    y = x_ref[...] + jnp.asarray(0.5, dtype=x_ref.dtype)
    # Numerically stable softplus: max(y, 0) + log1p(exp(-|y|)).
    sp = jnp.maximum(y, jnp.asarray(0, dtype=y.dtype)) + jnp.log1p(jnp.exp(-jnp.abs(y)))
    o_ref[...] = sp + jnp.asarray(1e-8, dtype=o_ref.dtype)


def _round_up(a, b):
    return -(-a // b) * b


def _pick_lane(total):
    """Largest multiple-of-128 divisor of `total` (prefer one leaving >=8 rows)."""
    best_any, best_dense = 0, 0
    lane = 128
    while lane <= _MAX_LANE and lane <= total:
        if total % lane == 0:
            best_any = lane
            if total // lane >= 8:
                best_dense = lane
        lane += 128
    return best_dense if best_dense else best_any


def _chip_profile():
    """(target bytes per block, minimum grid iterations) per TPU generation."""
    kind = ""
    try:
        kind = jax.devices()[0].device_kind.lower()
    except Exception:
        pass
    if "v5 lite" in kind or "v5e" in kind or "v5litepod" in kind:
        return (2 << 20, 1)   # v5e: 16 MiB default scoped VMEM -> keep 2 MiB blocks
    if "v7" in kind:
        return (4 << 20, 8)   # v7x: 2 TCs -> need multiple grid iters to use both
    return (4 << 20, 1)       # v6e / default


def _to_sigma_impl(x):
    orig_shape = x.shape
    total = x.size
    if total == 0:
        return x

    itemsize = jnp.dtype(x.dtype).itemsize
    row_align = max(8, 32 // max(1, itemsize))     # 8 for f32, 16 for bf16/f16
    block_bytes, min_blocks = _chip_profile()

    lane = _pick_lane(total)
    padded = lane == 0
    if padded:
        lane = _FALLBACK_LANE                      # rare: no 128-multiple divisor

    rows = -(-total // lane)                       # exact (no remainder) unless padded
    x_flat = x.reshape(-1)
    if padded:
        x_flat = jnp.pad(x_flat, (0, rows * lane - total))
    x2 = x_flat.reshape(rows, lane)

    # Row-block size: hit the per-block byte target, keep sublane alignment, and
    # guarantee enough grid iterations for megacore sharding on v7x.
    br = max(row_align, (block_bytes // (lane * itemsize)) // row_align * row_align)
    if min_blocks > 1:
        cap = _round_up(-(-rows // min_blocks), row_align)
        br = max(row_align, min(br, cap))
    if br >= rows:
        br = rows                                  # full-dim block is always legal
    grid = pl.cdiv(rows, br)                       # ragged last block is masked by Pallas

    out2 = pl.pallas_call(
        _to_sigma_kernel,
        out_shape=jax.ShapeDtypeStruct((rows, lane), x.dtype),
        grid=(grid,),
        in_specs=[pl.BlockSpec((br, lane), lambda i: (i, 0))],
        out_specs=pl.BlockSpec((br, lane), lambda i: (i, 0)),
        compiler_params=pltpu.CompilerParams(
            dimension_semantics=("parallel",)),
        cost_estimate=pl.CostEstimate(
            flops=5 * total,
            transcendentals=2 * total,
            bytes_accessed=2 * total * itemsize),
    )(x2)

    out = out2.reshape(-1)
    if padded:
        out = out[:total]
    return out.reshape(orig_shape)


# jit so wrapper reshapes are bitcasts and any residual pad/slice fuses.
to_sigma = jax.jit(_to_sigma_impl)


if __name__ == "__main__":
    key = jax.random.PRNGKey(0)
    N, C, H, W = 2, 4, 16, 16
    x = jax.random.normal(key, (N, C, H, W), dtype=jnp.float32)

    out = jax.block_until_ready(to_sigma(x))

    # Reference: F.softplus(x + 0.5) + 1e-8 (PyTorch default beta=1).
    ref = jax.nn.softplus(x + 0.5) + 1e-8
    assert out.shape == x.shape, out.shape
    assert jnp.allclose(out, ref, atol=1e-6, rtol=1e-6), "mismatch vs softplus reference"

    print("KERNEL_OK")
</pallas_src>

<mosaic_0001>
module attributes {stable_mosaic.version = 11 : i64} {
  func.func @_to_sigma_kernel(%arg0: i32, %arg1: memref<8x256xf32, #tpu.memory_space<vmem>>, %arg2: memref<8x256xf32, #tpu.memory_space<vmem>>) attributes {dimension_semantics = [#tpu.dimension_semantics<parallel>], iteration_bounds = array<i64: 1>, scalar_prefetch = 0 : i64, scratch_operands = 0 : i64, tpu.core_type = #tpu.core_type<tc>, window_params = [{transform_indices = @transform_0, window_bounds = array<i64: 8, 256>}, {transform_indices = @transform_1, window_bounds = array<i64: 8, 256>}]} {
    %c0 = arith.constant 0 : index
    %c0_0 = arith.constant 0 : index
    %0 = vector.load %arg1[%c0, %c0_0] : memref<8x256xf32, #tpu.memory_space<vmem>>, vector<8x256xf32>
    %cst = arith.constant 5.000000e-01 : f32
    %1 = vector.broadcast %cst : f32 to vector<8x256xf32>
    %2 = arith.addf %0, %1 : vector<8x256xf32>
    %cst_1 = arith.constant 0.000000e+00 : f32
    %3 = vector.broadcast %cst_1 : f32 to vector<8x256xf32>
    %4 = arith.maximumf %2, %3 : vector<8x256xf32>
    %5 = math.absf %2 : vector<8x256xf32>
    %cst_2 = arith.constant 0.000000e+00 : f32
    %6 = vector.broadcast %cst_2 : f32 to vector<8x256xf32>
    %7 = arith.subf %6, %5 : vector<8x256xf32>
    %8 = math.exp %7 : vector<8x256xf32>
    %9 = math.log1p %8 : vector<8x256xf32>
    %10 = arith.addf %4, %9 : vector<8x256xf32>
    %cst_3 = arith.constant 9.99999993E-9 : f32
    %11 = vector.broadcast %cst_3 : f32 to vector<8x256xf32>
    %12 = arith.addf %10, %11 : vector<8x256xf32>
    %c0_4 = arith.constant 0 : index
    %c0_5 = arith.constant 0 : index
    %13 = vector.load %arg2[%c0_4, %c0_5] : memref<8x256xf32, #tpu.memory_space<vmem>>, vector<8x256xf32>
    tpu.vector_store %arg2[%c0_4, %c0_5], %12 {strides = array<i32>} : memref<8x256xf32, #tpu.memory_space<vmem>>, vector<8x256xf32>,
    return
  }
  func.func @transform_0(%arg0: i32) -> (i32, i32) {
    %c0_i32 = arith.constant 0 : i32
    %c0_i32_0 = arith.constant 0 : i32
    return %arg0, %c0_i32 : i32, i32
  }
  func.func @transform_1(%arg0: i32) -> (i32, i32) {
    %c0_i32 = arith.constant 0 : i32
    %c0_i32_0 = arith.constant 0 : i32
    return %arg0, %c0_i32 : i32, i32
  }
}

</mosaic_0001>

<bundles_post_ra>
// kernel: _to_sigma_impl.1
= control target key start
LH: loop header
LB: loop body
LE: loop exit
PB: predicated region body
PF: predicated region fallthrough
CT: control target
= control target key end

     0   :  { %s80_s0 = inlined_call_operand.vmem [shape: f32[8,256], index: 0, kind: input, shape index: {}]   ;;  %s81_s1 = inlined_call_operand.vmem [shape: f32[8,256], index: 1, kind: output, shape index: {}]  }
   0x1   :  { %v8_v0 = vld [vmem:[%s80_s0] sm:$0xff]  ;;  %v9_v1 = vld [vmem:[%s80_s0 + $0x8] sm:$0xff] }
   0x2   :  { %v10_v2 = vadd.f32 0.5, %v8_v0  ;;  %v11_v3 = vadd.f32 0.5, %v9_v1 }
   0x4   :  { %v14_v4 = vand.u32 2147483647, %v10_v2  ;;  %v15_v5 = vand.u32 2147483647, %v11_v3  ;;  %v12_v22 = vmax.f32 %v10_v2, 0.0  ;;  %v13_v26 = vmax.f32 %v11_v3, 0.0 }
   0x6   :  { %v16_v6 = vsub.f32 0.0, %v14_v4  ;;  %v17_v7 = vsub.f32 0.0, %v15_v5 }
   0x8   :  { %v18_v8 = vmul.f32 1.442695, %v16_v6  ;;  %v20_v9 = vmul.f32 1.442695, %v17_v7 }
   0xa   :  { %50 = vpow2.f32 %v18_v8 }
   0xb   :  { %52 = vpow2.f32 %v20_v9 }
  0x10   :  { %v51_v10 = vpop.eup %50 }
  0x11   :  { %v53_v11 = vpop.eup %52  ;;  %v22_v12 = vadd.f32 1.0, %v51_v10  ;;  %v25_v13 = vmul.f32 -0.5, %v51_v10  ;;  %v28_v17 = vand.u32 2147483647, %v51_v10 }
  0x12   :  { %v31_v14 = vadd.f32 1.0, %v53_v11  ;;  %v34_v15 = vmul.f32 -0.5, %v53_v11  ;;  %v37_v19 = vand.u32 2147483647, %v53_v11 }
  0x13   :  { %54 = vlog2.f32 %v22_v12  ;;  %v26_v16 = vadd.f32 1.0, %v25_v13  ;;  %vm29_vm0 = vcmp.lt.f32.partialorder %v28_v17, 0.0004427343 }
  0x14   :  { %56 = vlog2.f32 %v31_v14  ;;  %v35_v18 = vadd.f32 1.0, %v34_v15  ;;  %vm38_vm1 = vcmp.lt.f32.partialorder %v37_v19, 0.0004427343 }
  0x15   :  { %v27_v20 = vmul.f32 %v51_v10, %v26_v16 }
  0x16   :  { %v36_v23 = vmul.f32 %v53_v11, %v35_v18 }
  0x19   :  { %v55_v21 = vpop.eup %54 }
  0x1a   :  { %v57_v24 = vpop.eup %56  ;;  %v24_v25 = vmul.f32 0.6931472, %v55_v21 }
  0x1b   :  { %v33_v27 = vmul.f32 0.6931472, %v57_v24 }
  0x1c   :  { %v30_v28 = vsel %vm29_vm0, %v27_v20, %v24_v25 }
  0x1d   :  { %v40_v29 = vadd.f32 %v30_v28, %v12_v22  ;;  %v39_v30 = vsel %vm38_vm1, %v36_v23, %v33_v27 }
  0x1e   :  { %v41_v31 = vadd.f32 %v39_v30, %v13_v26 }
  0x1f   :  { %v42_v32 = vadd.f32 1e-08, %v40_v29 }
  0x20   :  { %v43_v33 = vadd.f32 1e-08, %v41_v31 }
  0x21   :  { %44 = vst [vmem:[%s81_s1] sm:$0xff] %v42_v32 }
  0x22   :  { %45 = vst [vmem:[%s81_s1 + $0x8] sm:$0xff] %v43_v33 }

</bundles_post_ra>
